<compile_context>
chip_gen: v6e
topology: v6e:2x2x1
jax: 0.10.0
libtpu: 0.0.40
codegen_flags: <defaults>
</compile_context>

<pallas_src>
import functools

import jax
import jax.numpy as jnp
from jax.experimental import pallas as pl
from jax.experimental.pallas import tpu as pltpu


_TARGET_SLAB_BYTES = 4 << 20    # per-batch-row (tb=1) L-slab target
_MAX_BLOCK_BYTES = 8 << 20      # hard cap for one x block
_VMEM_BUDGET_BYTES = 24 << 20   # everything (double-buffered) must fit here
_MAX_L_CHUNKS = 64              # cap on unrolled 128-lane adds per grid step


def _choose_tiles(b, c, h, l, itemsize, target_slab_bytes):
    """Pick (tb, tl, l_pad, chunk): tl divides l_pad, tb divides b, chunk divides tl."""
    # ---------- L tile ----------
    if l % 128 == 0:
        l_pad = l
    elif c * l * 4 <= (2 << 20):
        # Unaligned but small: a single full-extent block is legal and cheap.
        l_pad = l
    else:
        # Unaligned and large: pad with zeros on the host (sum unaffected; the
        # mean divides by the true L), so the x stream stays tiled/pipelined.
        l_pad = ((l + 127) // 128) * 128

    if l_pad % 128 == 0:
        n128 = l_pad // 128
        max_d = max(1, min(_MAX_L_CHUNKS, target_slab_bytes // (128 * c * itemsize)))
        d = 1
        for cand in range(min(n128, max_d), 0, -1):
            if n128 % cand == 0:
                d = cand
                break
        tl = 128 * d
        chunk = 128
    else:
        tl = l_pad          # single full-extent block (small L only)
        chunk = tl

    # ---------- B tile (budget-driven; keep B//tb >= 2 for v7x's two TCs) ----
    w_bytes = 2 * c * h * 4            # upper bound for both weight tiles
    tb = 1
    for cand in range(b, 0, -1):
        if b % cand != 0:
            continue
        if b >= 2 and b // cand < 2:   # leave >=2 B-steps so both v7x TCs work
            continue
        x_block = cand * c * tl * itemsize
        acc_bytes = cand * c * chunk * 4
        out_bytes = 2 * cand * c * itemsize
        if (x_block <= _MAX_BLOCK_BYTES
                and 2 * x_block + acc_bytes + out_bytes + w_bytes <= _VMEM_BUDGET_BYTES):
            tb = cand
            break
    return tb, tl, l_pad, chunk


def _se_kernel(x_ref, w1t_ref, w2t_ref, o_ref, acc_ref, *, l_total, chunk):
    # x_ref  : (TB, C, TL)   native dtype (f32 or bf16)
    # w1t_ref: (C, H)        Linear1 weight, pre-transposed on the host
    # w2t_ref: (H, C)        Linear2 weight, pre-transposed on the host
    # o_ref  : (TB, 1, C)
    # acc_ref: (TB, C, chunk) f32 running partial sums over L
    il = pl.program_id(1)

    @pl.when(il == 0)
    def _():
        acc_ref[...] = jnp.zeros_like(acc_ref)

    # Hot loop: pure-VPU accumulation over static lane-aligned chunks; no
    # cross-lane reduce and no relayout per grid step.
    tl = x_ref.shape[-1]
    acc = acc_ref[...]
    for k in range(tl // chunk):           # static unroll
        acc += x_ref[:, :, k * chunk:(k + 1) * chunk].astype(jnp.float32)
    acc_ref[...] = acc

    @pl.when(il == pl.num_programs(1) - 1)
    def _():
        # Single XLU reduce, then the two tiny bias-free Linears on the MXU.
        y = jnp.sum(acc_ref[...], axis=-1) * (1.0 / float(l_total))      # (TB, C)
        w1t = w1t_ref[...].astype(jnp.float32)                            # (C, H)
        w2t = w2t_ref[...].astype(jnp.float32)                            # (H, C)
        hid = jnp.maximum(jnp.dot(y, w1t, preferred_element_type=jnp.float32), 0.0)
        z = jax.nn.sigmoid(jnp.dot(hid, w2t, preferred_element_type=jnp.float32))
        o_ref[...] = z[:, None, :].astype(o_ref.dtype)                    # (TB,1,C)


def se_layer(x, w1, w2, *, target_slab_bytes=_TARGET_SLAB_BYTES):
    """x: (B, C, L); w1: (H, C); w2: (C, H) -- PyTorch nn.Linear weight layout.

    Returns the SE gate with shape (B, C, 1), matching SELayer.forward.
    (Gate dtype follows x.dtype; all internal math is f32.)
    """
    b, c, l = x.shape
    h = w1.shape[0]
    assert w1.shape == (h, c) and w2.shape == (c, h)

    itemsize = jnp.dtype(x.dtype).itemsize
    tb, tl, l_pad, chunk = _choose_tiles(b, c, h, l, itemsize, target_slab_bytes)

    if l_pad != l:
        x = jnp.pad(x, ((0, 0), (0, 0), (0, l_pad - l)))   # zeros: sum unchanged

    # Pre-transpose the weights once on the host so the finalize is two plain
    # MXU dots with C on the lane axis.
    w1t = jnp.transpose(w1)    # (C, H)
    w2t = jnp.transpose(w2)    # (H, C)

    grid = (b // tb, l_pad // tl)
    # TODO(synk): if profiling shows the pipeline prologue dominating when a B
    # tile spans only 2-4 L steps, add pipeline_mode=pl.Buffered(3) on the x
    # BlockSpec (re-check the VMEM budget on v7x first).
    out = pl.pallas_call(
        functools.partial(_se_kernel, l_total=l, chunk=chunk),
        out_shape=jax.ShapeDtypeStruct((b, 1, c), x.dtype),
        grid=grid,
        in_specs=[
            pl.BlockSpec((tb, c, tl), lambda ib, il: (ib, 0, il)),
            pl.BlockSpec((c, h), lambda ib, il: (0, 0)),
            pl.BlockSpec((h, c), lambda ib, il: (0, 0)),
        ],
        out_specs=pl.BlockSpec((tb, 1, c), lambda ib, il: (ib, 0, 0)),
        scratch_shapes=[pltpu.VMEM((tb, c, chunk), jnp.float32)],
        compiler_params=pltpu.CompilerParams(
            dimension_semantics=("parallel", "arbitrary"),
            vmem_limit_bytes=32 * 1024 * 1024,   # safe on v5e/v6e/v7x
        ),
    )(x, w1t, w2t)

    # (B, 1, C) -> (B, C, 1): middle dim is 1, so this reshape preserves element
    # order (no transpose, effectively free).
    return out.reshape(b, c, 1)


def _reference(x, w1, w2):
    y = jnp.mean(x.astype(jnp.float32), axis=-1)                    # (B, C)
    hidden = jnp.maximum(y @ w1.astype(jnp.float32).T, 0.0)         # (B, H)
    z = jax.nn.sigmoid(hidden @ w2.astype(jnp.float32).T)           # (B, C)
    return z.reshape(x.shape[0], x.shape[1], 1)


if __name__ == "__main__":
    key = jax.random.PRNGKey(0)

    # Small shapes consistent with the module: B=2, C=32 (reduction=16 -> H=2), L=16.
    B, C, L, R = 2, 32, 16, 16
    H = C // R
    kx, k1, k2 = jax.random.split(key, 3)
    x = jax.random.normal(kx, (B, C, L), dtype=jnp.float32)
    # Deterministic synthetic weights (nn.Linear layout: (out_features, in_features)).
    w1 = jax.random.normal(k1, (H, C), dtype=jnp.float32) * (1.0 / jnp.sqrt(C))
    w2 = jax.random.normal(k2, (C, H), dtype=jnp.float32) * (1.0 / jnp.sqrt(H))

    out = jax.block_until_ready(se_layer(x, w1, w2))
    ref = _reference(x, w1, w2)
    assert out.shape == (B, C, 1), out.shape
    assert jnp.allclose(out, ref, atol=1e-5, rtol=1e-5), float(jnp.max(jnp.abs(out - ref)))

    # Tiled-L accumulator path: small slab target forces TL=512 -> 4 L steps,
    # tb=2 (B//tb=2), chunked 128-lane VPU accumulation carried across steps.
    B2, C2, L2 = 4, 32, 2048
    x2 = jax.random.normal(jax.random.fold_in(key, 1), (B2, C2, L2), dtype=jnp.float32)
    out2 = jax.block_until_ready(se_layer(x2, w1, w2, target_slab_bytes=64 * 1024))
    ref2 = _reference(x2, w1, w2)
    assert out2.shape == (B2, C2, 1), out2.shape
    assert jnp.allclose(out2, ref2, atol=1e-4, rtol=1e-4), float(jnp.max(jnp.abs(out2 - ref2)))

    # Unaligned-L fallback path (single full-extent block, no host padding).
    B3, C3, L3 = 2, 32, 300
    x3 = jax.random.normal(jax.random.fold_in(key, 2), (B3, C3, L3), dtype=jnp.float32)
    out3 = jax.block_until_ready(se_layer(x3, w1, w2))
    ref3 = _reference(x3, w1, w2)
    assert jnp.allclose(out3, ref3, atol=1e-4, rtol=1e-4), float(jnp.max(jnp.abs(out3 - ref3)))

    # bf16 x stream (native-dtype streaming, f32 math, bf16 gate).
    B4, C4, L4 = 2, 32, 256
    x4 = jax.random.normal(jax.random.fold_in(key, 3), (B4, C4, L4), dtype=jnp.float32)
    out4 = jax.block_until_ready(se_layer(x4.astype(jnp.bfloat16), w1, w2))
    ref4 = _reference(x4.astype(jnp.bfloat16), w1, w2)
    assert out4.dtype == jnp.bfloat16
    assert jnp.allclose(out4.astype(jnp.float32), ref4, atol=2e-2, rtol=2e-2)

    print("KERNEL_OK")
</pallas_src>

<mosaic_0001>
module attributes {stable_mosaic.version = 11 : i64} {
  func.func @_se_kernel(%arg0: i32, %arg1: i32, %arg2: memref<1x32x16xf32, #tpu.memory_space<vmem>>, %arg3: memref<32x2xf32, #tpu.memory_space<vmem>>, %arg4: memref<2x32xf32, #tpu.memory_space<vmem>>, %arg5: memref<1x1x32xf32, #tpu.memory_space<vmem>>, %arg6: memref<1x32x16xf32, #tpu.memory_space<vmem>>) attributes {dimension_semantics = [#tpu.dimension_semantics<parallel>, #tpu.dimension_semantics<arbitrary>], iteration_bounds = array<i64: 2, 1>, scalar_prefetch = 0 : i64, scratch_operands = 1 : i64, tpu.core_type = #tpu.core_type<tc>, window_params = [{transform_indices = @transform_0, window_bounds = array<i64: 1, 32, 16>}, {pipeline_mode = #tpu.pipeline_mode<synchronous>, transform_indices = @transform_1, window_bounds = array<i64: 32, 2>}, {pipeline_mode = #tpu.pipeline_mode<synchronous>, transform_indices = @transform_2, window_bounds = array<i64: 2, 32>}, {transform_indices = @transform_3, window_bounds = array<i64: 1, 1, 32>}]} {
    %c0_i32 = arith.constant 0 : i32
    %0 = arith.cmpi eq, %arg1, %c0_i32 : i32
    %1 = arith.extui %0 : i1 to i32
    %c0_i32_0 = arith.constant 0 : i32
    %2 = arith.cmpi ne, %1, %c0_i32_0 : i32
    scf.if %2 {
      %cst = arith.constant 0.000000e+00 : f32
      %10 = vector.broadcast %cst : f32 to vector<1x32x16xf32>
      %c0_11 = arith.constant 0 : index
      %c0_12 = arith.constant 0 : index
      %c0_13 = arith.constant 0 : index
      %11 = vector.load %arg6[%c0_11, %c0_12, %c0_13] : memref<1x32x16xf32, #tpu.memory_space<vmem>>, vector<1x32x16xf32>
      tpu.vector_store %arg6[%c0_11, %c0_12, %c0_13], %10 {strides = array<i32>} : memref<1x32x16xf32, #tpu.memory_space<vmem>>, vector<1x32x16xf32>,
    } else {
    }
    %c0 = arith.constant 0 : index
    %c0_1 = arith.constant 0 : index
    %c0_2 = arith.constant 0 : index
    %3 = vector.load %arg6[%c0, %c0_1, %c0_2] : memref<1x32x16xf32, #tpu.memory_space<vmem>>, vector<1x32x16xf32>
    %c0_3 = arith.constant 0 : index
    %c0_4 = arith.constant 0 : index
    %c0_5 = arith.constant 0 : index
    %4 = vector.load %arg2[%c0_3, %c0_4, %c0_5] : memref<1x32x16xf32, #tpu.memory_space<vmem>>, vector<1x32x16xf32>
    %5 = arith.addf %3, %4 : vector<1x32x16xf32>
    %c0_6 = arith.constant 0 : index
    %c0_7 = arith.constant 0 : index
    %c0_8 = arith.constant 0 : index
    %6 = vector.load %arg6[%c0_6, %c0_7, %c0_8] : memref<1x32x16xf32, #tpu.memory_space<vmem>>, vector<1x32x16xf32>
    tpu.vector_store %arg6[%c0_6, %c0_7, %c0_8], %5 {strides = array<i32>} : memref<1x32x16xf32, #tpu.memory_space<vmem>>, vector<1x32x16xf32>,
    %c0_i32_9 = arith.constant 0 : i32
    %7 = arith.cmpi eq, %arg1, %c0_i32_9 : i32
    %8 = arith.extui %7 : i1 to i32
    %c0_i32_10 = arith.constant 0 : i32
    %9 = arith.cmpi ne, %8, %c0_i32_10 : i32
    scf.if %9 {
      %c0_11 = arith.constant 0 : index
      %c0_12 = arith.constant 0 : index
      %c0_13 = arith.constant 0 : index
      %10 = vector.load %arg6[%c0_11, %c0_12, %c0_13] : memref<1x32x16xf32, #tpu.memory_space<vmem>>, vector<1x32x16xf32>
      %cst = arith.constant dense<0.000000e+00> : vector<1x32xf32>
      %11 = vector.multi_reduction <add>, %10, %cst [2] : vector<1x32x16xf32> to vector<1x32xf32>
      %cst_14 = arith.constant 6.250000e-02 : f32
      %12 = vector.broadcast %cst_14 : f32 to vector<1x32xf32>
      %13 = arith.mulf %11, %12 : vector<1x32xf32>
      %c0_15 = arith.constant 0 : index
      %c0_16 = arith.constant 0 : index
      %14 = vector.load %arg3[%c0_15, %c0_16] : memref<32x2xf32, #tpu.memory_space<vmem>>, vector<32x2xf32>
      %c0_17 = arith.constant 0 : index
      %c0_18 = arith.constant 0 : index
      %15 = vector.load %arg4[%c0_17, %c0_18] : memref<2x32xf32, #tpu.memory_space<vmem>>, vector<2x32xf32>
      %cst_19 = arith.constant dense<0.000000e+00> : vector<1x2xf32>
      %16 = tpu.matmul %13, %14, %cst_19 {dimension_numbers = #tpu.dot_dimension_numbers<[1], [0], [0], [1], [0, 0, 1, 1], [], []>} : vector<1x32xf32>, vector<32x2xf32>, vector<1x2xf32> -> vector<1x2xf32>
      %cst_20 = arith.constant 0.000000e+00 : f32
      %17 = vector.broadcast %cst_20 : f32 to vector<1x2xf32>
      %18 = arith.maximumf %16, %17 : vector<1x2xf32>
      %cst_21 = arith.constant dense<0.000000e+00> : vector<1x32xf32>
      %19 = tpu.matmul %18, %15, %cst_21 {dimension_numbers = #tpu.dot_dimension_numbers<[1], [0], [0], [1], [0, 0, 1, 1], [], []>} : vector<1x2xf32>, vector<2x32xf32>, vector<1x32xf32> -> vector<1x32xf32>
      %20 = arith.negf %19 : vector<1x32xf32>
      %21 = math.exp %20 : vector<1x32xf32>
      %cst_22 = arith.constant 1.000000e+00 : f32
      %22 = vector.broadcast %cst_22 : f32 to vector<1x32xf32>
      %23 = arith.addf %22, %21 : vector<1x32xf32>
      %24 = arith.divf %22, %23 : vector<1x32xf32>
      %25 = vector.shape_cast %24 : vector<1x32xf32> to vector<1x1x32xf32>
      %c0_23 = arith.constant 0 : index
      %c0_24 = arith.constant 0 : index
      %c0_25 = arith.constant 0 : index
      %26 = vector.load %arg5[%c0_23, %c0_24, %c0_25] : memref<1x1x32xf32, #tpu.memory_space<vmem>>, vector<1x1x32xf32>
      tpu.vector_store %arg5[%c0_23, %c0_24, %c0_25], %25 {strides = array<i32>} : memref<1x1x32xf32, #tpu.memory_space<vmem>>, vector<1x1x32xf32>,
    } else {
    }
    return
  }
  func.func @transform_0(%arg0: i32, %arg1: i32) -> (i32, i32, i32) {
    %c0_i32 = arith.constant 0 : i32
    %c0_i32_0 = arith.constant 0 : i32
    return %arg0, %c0_i32, %arg1 : i32, i32, i32
  }
  func.func @transform_1(%arg0: i32, %arg1: i32) -> (i32, i32) {
    %c0_i32 = arith.constant 0 : i32
    %c0_i32_0 = arith.constant 0 : i32
    %c0_i32_1 = arith.constant 0 : i32
    return %c0_i32, %c0_i32_0 : i32, i32
  }
  func.func @transform_2(%arg0: i32, %arg1: i32) -> (i32, i32) {
    %c0_i32 = arith.constant 0 : i32
    %c0_i32_0 = arith.constant 0 : i32
    %c0_i32_1 = arith.constant 0 : i32
    return %c0_i32, %c0_i32_0 : i32, i32
  }
  func.func @transform_3(%arg0: i32, %arg1: i32) -> (i32, i32, i32) {
    %c0_i32 = arith.constant 0 : i32
    %c0_i32_0 = arith.constant 0 : i32
    %c0_i32_1 = arith.constant 0 : i32
    return %arg0, %c0_i32, %c0_i32_0 : i32, i32, i32
  }
}

</mosaic_0001>

<bundles_post_ra>
// kernel: tpu_custom_call.1
= control target key start
LH: loop header
LB: loop body
LE: loop exit
PB: predicated region body
PF: predicated region fallthrough
CT: control target
= control target key end

     0   :  { %8 = vsyncpa [#allocation4], 0  ;;  %s850_s0 = inlined_call_operand.vmem [shape: f32[2,32,16], index: 0, kind: input, shape index: {}]   ;;  %s851_s1 = inlined_call_operand.vmem [shape: f32[32,2], index: 1, kind: input, shape index: {}]   ;;  %s852_s2 = inlined_call_operand.vmem [shape: f32[2,32], index: 2, kind: input, shape index: {}]   ;;  %s853_s3 = inlined_call_operand.hbm [shape: f32[2,1,32], index: 3, kind: output, shape index: {}]  }
   0x1   :  { %10 = vsyncpa [#allocation4 + $0x1], 0  ;;  %s718_s12 = smov 0   ;;  %s720_s13 = smov 0  }
   0x2   :  { %s722_s14 = smov 0   ;;  %s724_s15 = smov 0  }
   0x3   :  { %s726_s16 = smov 0   ;;  %s728_s17 = smov 0  }
   0x4 LB: > { %s518_s18 = sadd.s32 4294967295, %s693_s17   ;;  %s519_s19 = sadd.s32 4294967294, %s693_s17   ;;  %s693_s17 = sphi %s728_s17, %s16_s17   ;;  %s689_s16 = sphi %s726_s16, %s860_s16   ;;  %s685_s15 = sphi %s724_s15, %s859_s15   ;;  %s681_s14 = sphi %s722_s14, %s858_s14   ;;  %s677_s13 = sphi %s720_s13, %s857_s13   ;;  %s673_s12 = sphi %s718_s12, %s856_s12  }
   0x5   : > { %s28_s20 = sadd.s32 1, %s689_s16  ;;  %s105_s21 = sadd.s32 1, %s681_s14 }
   0x6   : > { %p30_p0 = scmp.ge.s32.totalorder %s28_s20, 2  ;;  %p115_p1 = scmp.ne.s32.totalorder %s681_s14, %s677_s13 }
   0x7   : > { %p116_p2 = scmp.eq.s32.totalorder %s518_s18, 1  ;;  %p121_p3 = scmp.ne.s32.totalorder %s677_s13, %s673_s12 }
   0x8   : > { %s862_s20 = smov (%p30_p0, %s28_s20), 0  ;;  %p122_p5 = scmp.eq.s32.totalorder %s519_s19, 1 }
   0x9   : > { %p758_p4 = por %p116_p2, %p115_p1  ;;  %s102_s23 = ssub.s32 %s689_s16, %s862_s20 }
   0xa   : > { %p522_p6 = scmp.ge.s32.totalorder %s693_s17, 1  ;;  %p103_p7 = scmp.eq.s32.totalorder %s102_s23, 0 }
   0xb   : > { %p765_p8 = por %p122_p5, %p121_p3  ;;  %p157_p9 = scmp.lt.s32.totalorder %s693_s17, 3 }
   0xc   : > { %s771_s25 = scalar_select %p103_p7, %s681_s14, %s105_s21  }
   0xd   : > { %p158_p10 = pnand %p522_p6, %p157_p9 }
   0xe   : > { %p183_p11 = scmp.lt.s32.totalorder (!%p158_p10), %s685_s15, 1  ;;  %s181_s21 = sand.u32 (!%p158_p10), 1, %s677_s13  }
   0xf   : > { %161 = sbr.rel (%p158_p10) target bundleno = 622 (0x26e), region = 32  ;;  %s529_s23 = sshll.u32 (!%p158_p10), %s685_s15, 4 }
  0x10   : > { %s437_s4 = scalar_lea.sflag (!%p158_p10), [#allocation4], %s181_s21  ;;  %s697_s6 = smov (!%p158_p10), [#allocation3]  }
  0x11   : > { %s621_s7 = sshll.u32 (!%p158_p10), %s697_s6, 4  ;;  %s622_s7 = int_to_ptr.vmem [resolvable:$false] %s621_s7 }
  0x14   : > { %vm195_vm0 = vcmask 130048   ;;  %v695_v0 = vmov 0.0   ;;  %s184_s26 = scalar_select %p183_p11, %s685_s15, 1  ;;  %v243_v21 = vld [vmem:[%s851_s1 + $0x18] sm:$0xff]  ;;  %v242_v22 = vld [vmem:[%s851_s1 + $0x10] sm:$0xff]  ;;  %v241_v23 = vld [vmem:[%s851_s1 + $0x8] sm:$0xff]  ;;  %v249_v25 = vlaneseq }
  0x15   : > { %196 = vst.msk [vmem:[#allocation2] sm:$0xff] %vm195_vm0, %v695_v0  ;;  %197 = vst.msk [vmem:[#allocation2 + $0x8] sm:$0xff] %vm195_vm0, %v695_v0  ;;  %540 = vmatprep.subr.mxu0 %v695_v0  ;;  %551 = vmatprep.subr.mxu1 %v695_v0  ;;  %v240_v24 = vld [vmem:[%s851_s1] sm:$0xff]  ;;  %vm696_vm1 = vmmov 0   ;;  %vm260_vm2 = vcmask 130112   ;;  %vm267_vm3 = vcmask 195712  }
  0x16   : > { %198 = vst.msk [vmem:[#allocation2 + $0x10] sm:$0xff] %vm195_vm0, %v695_v0  ;;  %199 = vst.msk [vmem:[#allocation2 + $0x18] sm:$0xff] %vm195_vm0, %v695_v0  ;;  %s532_s27 = sshll.u32 %s184_s26, 5  ;;  %541 = vmatpush3.msra.mxu0 %v243_v21  ;;  %548 = vmatprep.mubr.msk.f32.mxu0 %vm696_vm1, %v695_v0  ;;  %v250_v26 = vand.u32 127, %v249_v25  ;;  %v252_v27 = vshrl.u32 %v249_v25, 7  ;;  %vm274_vm4 = vcmask 261312  }
  0x17   : > { %s190_s30 = scalar_lea.vmem %s850_s0, %s532_s27  ;;  %542 = vmatprep.subr.mxu0 %v695_v0  ;;  %553 = vmatprep.mubr.msk.f32.mxu1 %vm696_vm1, %v695_v0  ;;  %vm276_vm5 = vcmask 261120   ;;  %v244_v50 = vld [vmem:[%s852_s2] sm:$0x3]  ;;  %vm354_vm6 = vcmask 1041408   ;;  %vm350_vm7 = vcmask 15360   ;;  %s182_s26 = scalar_lea.vmem [#allocation3], %s181_s21 }
  0x18   : > { %v204_v1 = vld [vmem:[%s190_s30] sm:$0xff]  ;;  %v206_v2 = vld [vmem:[%s190_s30 + $0x10] sm:$0xff]  ;;  %v205_v3 = vld [vmem:[%s190_s30 + $0x8] sm:$0xff]  ;;  %543 = vmatpush3.msra.mxu0 %v242_v22  ;;  %v255_v28 = vadd.s32 4294967288, %v250_v26  ;;  %v269_v29 = vadd.s32 4294967272, %v250_v26  ;;  %v262_v31 = vadd.s32 4294967280, %v250_v26  ;;  %v253_v33 = vsub.s32 %v250_v26, %v252_v27  ;;  %552 = vmatpush3.msk.msra.mxu1 %vm354_vm6, %v244_v50 }
  0x19   : > { %v207_v4 = vld [vmem:[%s190_s30 + $0x18] sm:$0xff]  ;;  %544 = vmatprep.subr.mxu0 %v695_v0  ;;  %s449_s27 = sshll.u32 %s182_s26, 4  ;;  %vm434_vm8 = vcmask 253952   ;;  %s810_s30 = scalar_lea.hbm %s853_s3, %s529_s23  ;;  %s450_s27 = int_to_ptr.vmem [resolvable:$true] %s449_s27 }
  0x1a   : > { %545 = vmatpush3.msra.mxu0 %v241_v23  ;;  %v258_v35 = vsub.s32 %v255_v28, %v252_v27  ;;  %v272_v36 = vsub.s32 %v269_v29, %v252_v27  ;;  %v265_v37 = vsub.s32 %v262_v31, %v252_v27  ;;  %s617_s5 = scalar_lea.vmem %s450_s27, 16  ;;  %s623_s15 = scalar_lea.vmem %s622_s7, 32 }
  0x1b   : > { %546 = vmatprep.subr.mxu0 %v695_v0  ;;  %p618_p12 = scmp.ne.s32.totalorder %s450_s27, %s617_s5  ;;  %p624_p1 = scmp.lt.s32.totalorder %s450_s27, %s622_s7 }
  0x1c   : > { %v200_v5 = vld [vmem:[#allocation2] sm:$0xff]  ;;  %v201_v7 = vld [vmem:[#allocation2 + $0x8] sm:$0xff]  ;;  %547 = vmatpush3.msra.mxu0 %v240_v24  ;;  %p625_p2 = scmp.lt.s32.totalorder %s623_s15, %s617_s5 }
  0x1d   : > { %v202_v6 = vld [vmem:[#allocation2 + $0x10] sm:$0xff]  ;;  %v208_v8 = vadd.f32 %v204_v1, %v200_v5  ;;  %v209_v10 = vadd.f32 %v205_v3, %v201_v7  ;;  %v203_v11 = vld [vmem:[#allocation2 + $0x18] sm:$0xff]  ;;  %p619_p13 = pnand %p618_p12, %p758_p4 }
  0x1e   : > { %v210_v9 = vadd.f32 %v206_v2, %v202_v6  ;;  %v211_v12 = vadd.f32 %v207_v4, %v203_v11  ;;  %p626_p3 = por %p625_p2, %p624_p1 }
  0x1f   : > { %213 = vst.msk [vmem:[#allocation2] sm:$0xff] %vm195_vm0, %v208_v8  ;;  %214 = vst.msk [vmem:[#allocation2 + $0x8] sm:$0xff] %vm195_vm0, %v209_v10  ;;  %p620_p0 = pneg %p619_p13 }
  0x20   : > { %215 = vst.msk [vmem:[#allocation2 + $0x10] sm:$0xff] %vm195_vm0, %v210_v9  ;;  %216 = vst.msk [vmem:[#allocation2 + $0x18] sm:$0xff] %vm195_vm0, %v211_v12 }
  0x21   : > { %p627_p5 = pnand %p626_p3, %p620_p0 }
  0x26   : > { %v220_v13 = vld [vmem:[#allocation2] sm:$0xff]  ;;  %v221_v15 = vld [vmem:[#allocation2 + $0x8] sm:$0xff] }
  0x27   : > { %v222_v14 = vld [vmem:[#allocation2 + $0x10] sm:$0xff]  ;;  %v224_v16 = vsel %vm195_vm0, %v220_v13, 0.0  ;;  %v223_v18 = vld [vmem:[#allocation2 + $0x18] sm:$0xff]  ;;  %v227_v19 = vsel %vm195_vm0, %v221_v15, 0.0 }
  0x28   : > { %v230_v17 = vsel %vm195_vm0, %v222_v14, 0.0  ;;  %225 = vadd.xlane.f32.xlu0 %v224_v16  ;;  %v233_v20 = vsel %vm195_vm0, %v223_v18, 0.0 }
  0x29   : > { %231 = vadd.xlane.f32.xlu1 %v230_v17 }
  0x2c   : > { %228 = vadd.xlane.f32.xlu0 %v227_v19 }
  0x2d   : > { %234 = vadd.xlane.f32.xlu1 %v233_v20 }
  0xb1   : > { %v226_v30 = vpop.xlane.xlu0 %225 }
  0xb2   : > { %v232_v32 = vpop.xlane.xlu1 %231  ;;  %v236_v34 = vmul.f32 0.0625, %v226_v30 }
  0xb3   : > { %v238_v38 = vmul.f32 0.0625, %v232_v32 }
  0xb4   : > { %v254_v43 = vrot.slane %v236_v34, %v253_v33 }
  0xb5   : > { %v229_v39 = vpop.xlane.xlu0 %228  ;;  %v266_v46 = vrot.slane %v238_v38, %v265_v37 }
  0xb6   : > { %v235_v40 = vpop.xlane.xlu1 %234  ;;  %v237_v41 = vmul.f32 0.0625, %v229_v39 }
  0xb7   : > { %v239_v42 = vmul.f32 0.0625, %v235_v40 }
  0xb8   : > { %v259_v44 = vrot.slane %v237_v41, %v258_v35 }
  0xb9   : > { %v273_v45 = vrot.slane %v239_v42, %v272_v36 }
  0xba   : > { %v261_v47 = vsel %vm260_vm2, %v259_v44, %v254_v43 }
  0xbb   : > { %v268_v48 = vsel %vm267_vm3, %v266_v46, %v261_v47 }
  0xbc   : > { %v275_v49 = vsel %vm274_vm4, %v273_v45, %v268_v48 }
  0xbd   : > { %549 = vmatmul.mubr.msk.f32.vlgmr.msra.gmra.mxu0 %vm276_vm5, %v275_v49 }
 0x17d   : > { %v345_v51 = vpop.f32.mrf.mxu0 }
 0x17e   : > { %v349_v52 = vmax.f32 %v345_v51, 0.0 }
 0x17f   : > { %v550_v53 = vpop.f32.mrf.mxu0 }
 0x180   : > { %554 = vmatmul.mubr.msk.f32.vlgmr.msra.gmra.mxu1 %vm350_vm7, %v349_v52 }
 0x240   : > { %v424_v54 = vpop.f32.mrf.mxu1 }
 0x241   : > { %v528_v55 = vmul.f32 -1.442695, %v424_v54 }
 0x242   : > { %v555_v56 = vpop.f32.mrf.mxu1 }
 0x243   : > { %613 = vpow2.f32 %v528_v55 }
 0x250   : > { %v614_v57 = vpop.eup %613 }
 0x251   : > { %v431_v58 = vadd.f32 1.0, %v614_v57 }
 0x253   : > { %615 = vrcp.f32 %v431_v58 }
 0x260   : > { %v616_v59 = vpop.eup %615 }
 0x261   : > { %435 = vst.msk [vmem:[%s182_s26] sm:$0x1] %vm434_vm8, %v616_v59 }
 0x262   : > { %630 = shalt.err (!%p627_p5)
}
 0x263   : > { %s631_s8 = scalar_lea.hbm %s810_s30, 16  ;;  %s635_s11 = scalar_lea.hbm %s853_s3, 32 }
 0x264   : > { %p632_p6 = scmp.ne.s32.totalorder %s810_s30, %s631_s8  ;;  %p636_p10 = scmp.lt.s32.totalorder %s810_s30, %s853_s3 }
 0x265   : > { %p637_p11 = scmp.lt.s32.totalorder %s635_s11, %s631_s8 }
 0x266   : > { %p633_p7 = pnand %p632_p6, %p758_p4 }
 0x267   : > { %p638_p12 = por %p637_p11, %p636_p10 }
 0x268   : > { %p634_p9 = pneg %p633_p7 }
 0x26a   : > { %p639_p13 = pnand %p638_p12, %p634_p9 }
 0x26c   : > { %642 = shalt.err (!%p639_p13)
}
 0x26d   : > { %556 = dma.vmem_to_hbm [thread:$0]  (%p758_p4), %s450_s27, 16, %s810_s30, %s437_s4  }
 0x26e PF: > { %p562_p0 = scmp.ge.s32.totalorder %s693_s17, 2  ;;  %s461_s21 = sand.u32 1, %s673_s12  }
 0x26f   : > { %s462_s23 = scalar_lea.sflag [#allocation4], %s461_s21 }
 0x270   : > { %p559_p1 = pnand %p562_p0, %p765_p8 }
 0x272   : > { %p560_p2 = pneg %p559_p1 }
 0x274   : > { %668 = dma.done.wait (%p560_p2), %s462_s23, 16  }
 0x275   : > { %670 = vsyncadd (%p560_p2), %s462_s23, 4294967280  ;;  %s16_s17 = sadd.s32 1, %s693_s17   ;;  %s856_s12 = smov %s677_s13 }
 0x276   : > { %p13_p3 = scmp.ge.s32.totalorder %s16_s17, 4   ;;  %s857_s13 = smov %s681_s14 }
 0x277   : > { %s858_s14 = smov %s771_s25  ;;  %s859_s15 = smov %s689_s16 }
 0x278   : > { %s860_s16 = smov %s862_s20  ;;  %15 = sbr.rel (!%p13_p3) target bundleno = 4 (0x4), region = 75 }
 0x27d   :  { %466 = vsyncpa [#allocation4], 1 }
 0x27e   :  { %468 = vsyncpa [#allocation4 + $0x1], 1 }

</bundles_post_ra>
